<compile_context>
chip_gen: v5e
topology: v5e:2x2
jax: 0.10.0
libtpu: 0.0.40
codegen_flags: <defaults>
</compile_context>

<pallas_src>
import math

import jax
import jax.numpy as jnp
from jax.experimental import pallas as pl
from jax.experimental.pallas import tpu as pltpu


def _resolve_shape(total, shape):
    """Resolve a torch-style view shape (may contain a single -1)."""
    shape = tuple(int(s) for s in shape)
    if shape.count(-1) > 1:
        raise ValueError("only one dimension can be inferred")
    if -1 in shape:
        known = 1
        for s in shape:
            if s != -1:
                known *= s
        if known == 0 or total % known != 0:
            raise ValueError(f"shape {shape} is invalid for input of size {total}")
        shape = tuple(total // known if s == -1 else s for s in shape)
    if math.prod(shape) != total:
        raise ValueError(f"shape {shape} is invalid for input of size {total}")
    return shape


# Only split the copy into several concurrent DMAs when each chunk carries at
# least this many bytes; below that a single descriptor already saturates and
# extra descriptors are pure issue overhead.
_MIN_CHUNK_BYTES = 256 * 1024
_MAX_CHUNKS = 8


def _chunk_bounds(dim0, total_bytes):
    """Static (start, size) splits of the leading output dim for the DMAs."""
    if dim0 <= 1 or total_bytes < 2 * _MIN_CHUNK_BYTES:
        return ((0, dim0),)
    n = min(_MAX_CHUNKS, dim0, max(1, total_bytes // _MIN_CHUNK_BYTES))
    base, rem = divmod(dim0, n)
    bounds = []
    start = 0
    for i in range(n):
        size = base + (1 if i < rem else 0)
        bounds.append((start, size))
        start += size
    return tuple(bounds)


def _make_dma_copy_kernel(bounds):
    """HBM->HBM identity copy via one or a few chunked async DMAs."""
    n_chunks = len(bounds)

    def kernel(x_ref, o_ref, sems):
        if n_chunks == 1:
            # Whole-ref copy: safest / cheapest path (small or ragged arrays).
            cp = pltpu.make_async_copy(x_ref, o_ref, sems.at[0])
            cp.start()
            cp.wait()
            return
        copies = []
        for i, (start, size) in enumerate(bounds):
            cp = pltpu.make_async_copy(
                x_ref.at[pl.ds(start, size)],
                o_ref.at[pl.ds(start, size)],
                sems.at[i],
            )
            cp.start()  # issue all descriptors first -> concurrent DMA engines
            copies.append(cp)
        for cp in copies:
            cp.wait()

    return kernel


def pallas_view(x, shape, materialize=True):
    """Equivalent of torch.Tensor.view(shape); copy done as HBM->HBM DMA."""
    total = x.size
    out_shape = _resolve_shape(total, shape)

    if not materialize or total == 0 or len(out_shape) == 0:
        # A view of a contiguous tensor is metadata-only (or degenerate):
        # skip the copy entirely.
        return jnp.reshape(x, out_shape)

    dtype = x.dtype
    itemsize = jnp.dtype(dtype).itemsize

    # The view itself: row-major reshape (metadata / bitcast in XLA).  No
    # padding, no slicing -- ragged totals are copied exactly as-is.
    x_view = jnp.reshape(x, out_shape)

    bounds = _chunk_bounds(out_shape[0], total * itemsize)

    return pl.pallas_call(
        _make_dma_copy_kernel(bounds),
        out_shape=jax.ShapeDtypeStruct(out_shape, dtype),
        in_specs=[pl.BlockSpec(memory_space=pl.ANY)],
        out_specs=pl.BlockSpec(memory_space=pl.ANY),
        scratch_shapes=[pltpu.SemaphoreType.DMA((len(bounds),))],
        cost_estimate=pl.CostEstimate(
            flops=0, transcendentals=0, bytes_accessed=2 * total * itemsize
        ),
    )(x_view)


if __name__ == "__main__":
    key = jax.random.PRNGKey(0)

    # View(shape=(2, -1)): NCHW conv activation (2, 4, 16, 16) -> (2, 1024).
    x = jax.random.normal(key, (2, 4, 16, 16), dtype=jnp.float32)
    out = pallas_view(x, (2, -1))
    jax.block_until_ready(out)
    ref = jnp.reshape(x, (2, 1024))
    assert out.shape == (2, 1024), out.shape
    assert out.dtype == x.dtype
    assert bool(jnp.array_equal(out, ref))

    # Larger slab exercising the multi-DMA chunked path:
    # (16, 64, 128) f32 = 512 KiB -> two concurrent 256 KiB DMAs.
    x2 = jax.random.normal(jax.random.PRNGKey(1), (16, 64, 128), dtype=jnp.float32)
    out2 = pallas_view(x2, (-1, 128))
    jax.block_until_ready(out2)
    assert bool(jnp.array_equal(out2, jnp.reshape(x2, (1024, 128))))

    # Ragged + sub-32-bit dtype: (3, 5, 7) bf16 -> flat (105,).
    # No jnp.pad / post-slice -- the DMA copies the exact 105 elements.
    x3 = jax.random.normal(jax.random.PRNGKey(2), (3, 5, 7), dtype=jnp.bfloat16)
    out3 = pallas_view(x3, (-1,))
    jax.block_until_ready(out3)
    assert bool(jnp.array_equal(out3, jnp.reshape(x3, (105,))))

    print("KERNEL_OK")
</pallas_src>

<mosaic_0001>
module attributes {stable_mosaic.version = 11 : i64} {
  func.func @kernel(%arg0: memref<2x1024xf32, #tpu.memory_space<any>>, %arg1: memref<2x1024xf32, #tpu.memory_space<any>>, %arg2: memref<1x!tpu.dma_semaphore, #tpu.memory_space<semaphore_mem>>) attributes {dimension_semantics = [], scalar_prefetch = 0 : i64, scratch_operands = 1 : i64, tpu.core_type = #tpu.core_type<tc>} {
    %c0_i32 = arith.constant 0 : i32
    %0 = tpu.memref_slice %arg2[%c0_i32] : memref<1x!tpu.dma_semaphore, #tpu.memory_space<semaphore_mem>> -> memref<1x!tpu.dma_semaphore, #tpu.memory_space<semaphore_mem>>
    %1 = tpu.memref_squeeze %0 : memref<1x!tpu.dma_semaphore, #tpu.memory_space<semaphore_mem>> -> memref<!tpu.dma_semaphore, #tpu.memory_space<semaphore_mem>>
    tpu.enqueue_dma source(%arg0 : memref<2x1024xf32, #tpu.memory_space<any>>) target(%arg1 : memref<2x1024xf32, #tpu.memory_space<any>>) target_semaphore(%1 : memref<!tpu.dma_semaphore, #tpu.memory_space<semaphore_mem>>)
    %c0_i32_0 = arith.constant 0 : i32
    %2 = tpu.memref_slice %arg2[%c0_i32_0] : memref<1x!tpu.dma_semaphore, #tpu.memory_space<semaphore_mem>> -> memref<1x!tpu.dma_semaphore, #tpu.memory_space<semaphore_mem>>
    %3 = tpu.memref_squeeze %2 : memref<1x!tpu.dma_semaphore, #tpu.memory_space<semaphore_mem>> -> memref<!tpu.dma_semaphore, #tpu.memory_space<semaphore_mem>>
    tpu.wait_dma2 semaphore(%3 : memref<!tpu.dma_semaphore, #tpu.memory_space<semaphore_mem>>) src(%arg0 : memref<2x1024xf32, #tpu.memory_space<any>>) dst(%arg1 : memref<2x1024xf32, #tpu.memory_space<any>>)
    return
  }
}

</mosaic_0001>

<bundles_post_ra>
// kernel: tpu_custom_call.1
= control target key start
LH: loop header
LB: loop body
LE: loop exit
PB: predicated region body
PF: predicated region fallthrough
CT: control target
= control target key end

     0   :  { %s33_s12 = smov [#allocation2]   ;;  %s34_s13 = smov [#allocation3]   ;;  %s52_s0 = inlined_call_operand.hbm [shape: f32[2,1024], index: 0, kind: input, shape index: {}]   ;;  %s53_s1 = inlined_call_operand.hbm [shape: f32[2,1024], index: 1, kind: output, shape index: {}]  }
   0x1   :  { %s10_s8 = sshll.u32 %s52_s0, 4  ;;  %s12_s11 = sshll.u32 %s53_s1, 4  ;;  %s11_s8 = int_to_ptr.hbm [resolvable:$true] %s10_s8  ;;  %s13_s11 = int_to_ptr.hbm [resolvable:$true] %s12_s11 }
   0x2   :  { %s35_s14 = smov 0  }
   0x3   :  { %16 = dma.general %s11_s8, 256, %s13_s11, %s33_s12, %s34_s13, [#allocation4], %s35_s14, 0  }
   0x4   :  { %31 = dma.done.wait [#allocation2], 256 }
   0x5   :  { %32 = vsyncadd [#allocation2], 4294967040 }
   0x6   :  { %21 = vsyncmov [#allocation2] }
   0x9   :  { %s22_s15 = vpop.sfrf %21 }
   0xa   :  { %p27_p0 = scmp.ne.s32.totalorder %s22_s15, 0 }
   0xc   :  { %26 = shalt.err (%p27_p0)  }

</bundles_post_ra>
